<compile_context>
chip_gen: v7x
topology: tpu7x:2x2x1
jax: 0.10.0
libtpu: 0.0.40
codegen_flags: <defaults>
</compile_context>

<pallas_src>
import jax
import jax.numpy as jnp
from jax.experimental import pallas as pl
from jax.experimental.pallas import tpu as pltpu

BOARD_SIZE = 16
H1 = 128
H2 = 64
OUT_PAD = 128          # lane-dense padded width used only for in-kernel compute
TILE_B_MAX = 1024      # batch-tile cap (multiple of 16 for bf16 sublane packing)
NEG_PAD = -1e30        # padded-lane logit -> exp() underflows to 0


def _round_up(n, m):
    return ((n + m - 1) // m) * m


def _pick_tile_b(batch):
    """Batch tile: <= TILE_B_MAX, multiple of 16, and >= 2 grid steps when the
    batch is large enough (keeps both v7x TensorCores busy)."""
    rows = max(_round_up(batch, 16), 16)
    if rows < 32:
        return rows
    half = _round_up((rows + 1) // 2, 16)
    return max(min(TILE_B_MAX, half), 16)


def nn_kernel(x_ref, w1_ref, b1_ref, w2_ref, b2_ref, w3_ref, b3_ref, o_ref):
    # ---- Linear(16 -> 128) + ReLU (bf16 MXU inputs, f32 accumulate) ----
    x = x_ref[...]                                            # bf16 (tile, 16)
    h1 = jnp.dot(x, w1_ref[...], preferred_element_type=jnp.float32)
    h1 = jnp.maximum(h1 + b1_ref[...], 0.0)

    # ---- Linear(128 -> 64) + ReLU ----
    h2 = jnp.dot(h1.astype(jnp.bfloat16), w2_ref[...],
                 preferred_element_type=jnp.float32)
    h2 = jnp.maximum(h2 + b2_ref[...], 0.0)

    # ---- Linear(64 -> 16); compute on 128 padded lanes, padded bias = -1e30 ----
    logits = jnp.dot(h2.astype(jnp.bfloat16), w3_ref[...],
                     preferred_element_type=jnp.float32)
    logits = logits + b3_ref[...]

    # ---- per-row softmax (== Softmax(dim=0) of the 1-D module) ----
    m = jnp.max(logits, axis=-1, keepdims=True)
    e = jnp.exp(logits - m)                                   # padded lanes -> 0
    denom = jnp.sum(e, axis=-1, keepdims=True)
    probs = e * pl.reciprocal(denom, approx=True)

    # Store only the real 16 output features (16-wide HBM writeback).
    o_ref[...] = probs[:, :BOARD_SIZE]


def nn_forward(x, params):
    """x: (board_size,) or (B, board_size) -> same-leading-shape probabilities."""
    w1, b1, w2, b2, w3, b3 = params

    single = (x.ndim == 1)
    xb = x.reshape(1, -1) if single else x
    xb = xb.astype(jnp.bfloat16)            # halve input DMA; MXU eats bf16 anyway
    B = xb.shape[0]

    tile_b = _pick_tile_b(B)
    Bp = _round_up(B, tile_b)
    if Bp != B:
        xb = jnp.pad(xb, ((0, Bp - B), (0, 0)))

    # Kernel-ready params: bf16 weights, f32 biases, lane-padded layer 3.
    w1k = w1.astype(jnp.bfloat16)
    w2k = w2.astype(jnp.bfloat16)
    w3k = jnp.pad(w3, ((0, 0), (0, OUT_PAD - BOARD_SIZE))).astype(jnp.bfloat16)
    b3k = jnp.pad(b3, ((0, 0), (0, OUT_PAD - BOARD_SIZE)),
                  constant_values=NEG_PAD).astype(jnp.float32)

    out = pl.pallas_call(
        nn_kernel,
        out_shape=jax.ShapeDtypeStruct((Bp, BOARD_SIZE), jnp.float32),
        grid=(Bp // tile_b,),
        in_specs=[
            pl.BlockSpec((tile_b, BOARD_SIZE), lambda i: (i, 0)),  # x: streams
            pl.BlockSpec((BOARD_SIZE, H1), lambda i: (0, 0)),      # w1: resident
            pl.BlockSpec((1, H1), lambda i: (0, 0)),               # b1: resident
            pl.BlockSpec((H1, H2), lambda i: (0, 0)),              # w2: resident
            pl.BlockSpec((1, H2), lambda i: (0, 0)),               # b2: resident
            pl.BlockSpec((H2, OUT_PAD), lambda i: (0, 0)),         # w3: resident
            pl.BlockSpec((1, OUT_PAD), lambda i: (0, 0)),          # b3: resident
        ],
        out_specs=pl.BlockSpec((tile_b, BOARD_SIZE), lambda i: (i, 0)),
        compiler_params=pltpu.CompilerParams(
            dimension_semantics=("parallel",)),
    )(xb, w1k, b1.astype(jnp.float32), w2k, b2.astype(jnp.float32), w3k, b3k)

    out = out[:B]
    return out.reshape(BOARD_SIZE) if single else out


def init_params(key):
    """Deterministic synthetic parameters, stored (in, out) so x @ W + b
    matches PyTorch's x @ W_pt.T + b."""
    ks = jax.random.split(key, 6)
    scale = 0.1
    w1 = scale * jax.random.normal(ks[0], (BOARD_SIZE, H1), jnp.float32)
    b1 = scale * jax.random.normal(ks[1], (1, H1), jnp.float32)
    w2 = scale * jax.random.normal(ks[2], (H1, H2), jnp.float32)
    b2 = scale * jax.random.normal(ks[3], (1, H2), jnp.float32)
    w3 = scale * jax.random.normal(ks[4], (H2, BOARD_SIZE), jnp.float32)
    b3 = scale * jax.random.normal(ks[5], (1, BOARD_SIZE), jnp.float32)
    return (w1, b1, w2, b2, w3, b3)


def nn_reference(x, params):
    """Pure-JAX reference using the same bf16-weight / f32-accumulate math."""
    w1, b1, w2, b2, w3, b3 = params
    xb = x.reshape(-1, BOARD_SIZE).astype(jnp.bfloat16)
    h = jnp.dot(xb, w1.astype(jnp.bfloat16),
                preferred_element_type=jnp.float32) + b1
    h = jnp.maximum(h, 0.0)
    h = jnp.dot(h.astype(jnp.bfloat16), w2.astype(jnp.bfloat16),
                preferred_element_type=jnp.float32) + b2
    h = jnp.maximum(h, 0.0)
    logits = jnp.dot(h.astype(jnp.bfloat16), w3.astype(jnp.bfloat16),
                     preferred_element_type=jnp.float32) + b3
    return jax.nn.softmax(logits, axis=-1)


if __name__ == "__main__":
    key = jax.random.PRNGKey(0)
    pkey, xkey = jax.random.split(key)
    params = init_params(pkey)

    # Batched board states (two 256-row grid steps -> both v7x cores get work).
    B = 512
    xb = jax.random.normal(xkey, (B, BOARD_SIZE), jnp.float32)

    out = jax.block_until_ready(nn_forward(xb, params))
    ref = jax.block_until_ready(nn_reference(xb, params))

    assert out.shape == (B, BOARD_SIZE)
    assert jnp.allclose(jnp.sum(out, axis=-1), 1.0, atol=2e-3)
    assert jnp.allclose(out, ref, atol=2e-3, rtol=1e-3)

    # Non-multiple batch size exercises the padded last tile.
    out_odd = jax.block_until_ready(nn_forward(xb[:300], params))
    assert out_odd.shape == (300, BOARD_SIZE)
    assert jnp.allclose(out_odd, ref[:300], atol=2e-3, rtol=1e-3)

    # Single board-state path (original 1-D PyTorch module interface).
    out1 = jax.block_until_ready(nn_forward(xb[0], params))
    assert out1.shape == (BOARD_SIZE,)
    assert jnp.allclose(out1, ref[0], atol=2e-3, rtol=1e-3)

    print("KERNEL_OK")
</pallas_src>

<mosaic_0001>
module attributes {stable_mosaic.version = 11 : i64} {
  func.func @nn_kernel(%arg0: i32, %arg1: memref<256x16xbf16, #tpu.memory_space<vmem>>, %arg2: memref<16x128xbf16, #tpu.memory_space<vmem>>, %arg3: memref<1x128xf32, #tpu.memory_space<vmem>>, %arg4: memref<128x64xbf16, #tpu.memory_space<vmem>>, %arg5: memref<1x64xf32, #tpu.memory_space<vmem>>, %arg6: memref<64x128xbf16, #tpu.memory_space<vmem>>, %arg7: memref<1x128xf32, #tpu.memory_space<vmem>>, %arg8: memref<256x16xf32, #tpu.memory_space<vmem>>) attributes {dimension_semantics = [#tpu.dimension_semantics<parallel>], iteration_bounds = array<i64: 2>, scalar_prefetch = 0 : i64, scratch_operands = 0 : i64, tpu.core_type = #tpu.core_type<tc>, window_params = [{transform_indices = @transform_0, window_bounds = array<i64: 256, 16>}, {pipeline_mode = #tpu.pipeline_mode<synchronous>, transform_indices = @transform_1, window_bounds = array<i64: 16, 128>}, {pipeline_mode = #tpu.pipeline_mode<synchronous>, transform_indices = @transform_2, window_bounds = array<i64: 1, 128>}, {pipeline_mode = #tpu.pipeline_mode<synchronous>, transform_indices = @transform_3, window_bounds = array<i64: 128, 64>}, {pipeline_mode = #tpu.pipeline_mode<synchronous>, transform_indices = @transform_4, window_bounds = array<i64: 1, 64>}, {pipeline_mode = #tpu.pipeline_mode<synchronous>, transform_indices = @transform_5, window_bounds = array<i64: 64, 128>}, {pipeline_mode = #tpu.pipeline_mode<synchronous>, transform_indices = @transform_6, window_bounds = array<i64: 1, 128>}, {transform_indices = @transform_7, window_bounds = array<i64: 256, 16>}]} {
    %c0 = arith.constant 0 : index
    %c0_0 = arith.constant 0 : index
    %0 = vector.load %arg1[%c0, %c0_0] : memref<256x16xbf16, #tpu.memory_space<vmem>>, vector<256x16xbf16>
    %c0_1 = arith.constant 0 : index
    %c0_2 = arith.constant 0 : index
    %1 = vector.load %arg2[%c0_1, %c0_2] : memref<16x128xbf16, #tpu.memory_space<vmem>>, vector<16x128xbf16>
    %cst = arith.constant dense<0.000000e+00> : vector<256x128xf32>
    %2 = tpu.matmul %0, %1, %cst {dimension_numbers = #tpu.dot_dimension_numbers<[1], [0], [0], [1], [0, 0, 1, 1], [], []>} : vector<256x16xbf16>, vector<16x128xbf16>, vector<256x128xf32> -> vector<256x128xf32>
    %c0_3 = arith.constant 0 : index
    %c0_4 = arith.constant 0 : index
    %3 = vector.load %arg3[%c0_3, %c0_4] : memref<1x128xf32, #tpu.memory_space<vmem>>, vector<1x128xf32>
    %4 = vector.broadcast %3 : vector<1x128xf32> to vector<256x128xf32>
    %5 = arith.addf %2, %4 : vector<256x128xf32>
    %cst_5 = arith.constant 0.000000e+00 : f32
    %6 = vector.broadcast %cst_5 : f32 to vector<256x128xf32>
    %7 = arith.maximumf %5, %6 : vector<256x128xf32>
    %8 = arith.truncf %7 : vector<256x128xf32> to vector<256x128xbf16>
    %c0_6 = arith.constant 0 : index
    %c0_7 = arith.constant 0 : index
    %9 = vector.load %arg4[%c0_6, %c0_7] : memref<128x64xbf16, #tpu.memory_space<vmem>>, vector<128x64xbf16>
    %cst_8 = arith.constant dense<0.000000e+00> : vector<256x64xf32>
    %10 = tpu.matmul %8, %9, %cst_8 {dimension_numbers = #tpu.dot_dimension_numbers<[1], [0], [0], [1], [0, 0, 1, 1], [], []>} : vector<256x128xbf16>, vector<128x64xbf16>, vector<256x64xf32> -> vector<256x64xf32>
    %c0_9 = arith.constant 0 : index
    %c0_10 = arith.constant 0 : index
    %11 = vector.load %arg5[%c0_9, %c0_10] : memref<1x64xf32, #tpu.memory_space<vmem>>, vector<1x64xf32>
    %12 = vector.broadcast %11 : vector<1x64xf32> to vector<256x64xf32>
    %13 = arith.addf %10, %12 : vector<256x64xf32>
    %cst_11 = arith.constant 0.000000e+00 : f32
    %14 = vector.broadcast %cst_11 : f32 to vector<256x64xf32>
    %15 = arith.maximumf %13, %14 : vector<256x64xf32>
    %16 = arith.truncf %15 : vector<256x64xf32> to vector<256x64xbf16>
    %c0_12 = arith.constant 0 : index
    %c0_13 = arith.constant 0 : index
    %17 = vector.load %arg6[%c0_12, %c0_13] : memref<64x128xbf16, #tpu.memory_space<vmem>>, vector<64x128xbf16>
    %cst_14 = arith.constant dense<0.000000e+00> : vector<256x128xf32>
    %18 = tpu.matmul %16, %17, %cst_14 {dimension_numbers = #tpu.dot_dimension_numbers<[1], [0], [0], [1], [0, 0, 1, 1], [], []>} : vector<256x64xbf16>, vector<64x128xbf16>, vector<256x128xf32> -> vector<256x128xf32>
    %c0_15 = arith.constant 0 : index
    %c0_16 = arith.constant 0 : index
    %19 = vector.load %arg7[%c0_15, %c0_16] : memref<1x128xf32, #tpu.memory_space<vmem>>, vector<1x128xf32>
    %20 = vector.broadcast %19 : vector<1x128xf32> to vector<256x128xf32>
    %21 = arith.addf %18, %20 : vector<256x128xf32>
    %cst_17 = arith.constant dense<0xFF800000> : vector<256xf32>
    %22 = vector.multi_reduction <maximumf>, %21, %cst_17 [1] : vector<256x128xf32> to vector<256xf32>
    %23 = vector.shape_cast %22 : vector<256xf32> to vector<256x1xf32>
    %24 = vector.broadcast %23 : vector<256x1xf32> to vector<256x128xf32>
    %25 = arith.subf %21, %24 : vector<256x128xf32>
    %26 = math.exp %25 : vector<256x128xf32>
    %cst_18 = arith.constant dense<0.000000e+00> : vector<256xf32>
    %27 = vector.multi_reduction <add>, %26, %cst_18 [1] : vector<256x128xf32> to vector<256xf32>
    %28 = vector.shape_cast %27 : vector<256xf32> to vector<256x1xf32>
    %29 = tpu.reciprocal %28 {approx = true} : vector<256x1xf32> -> vector<256x1xf32>
    %30 = vector.broadcast %29 : vector<256x1xf32> to vector<256x128xf32>
    %31 = arith.mulf %26, %30 : vector<256x128xf32>
    %32 = vector.extract_strided_slice %31 {offsets = [0, 0], sizes = [256, 16], strides = [1, 1]} : vector<256x128xf32> to vector<256x16xf32>
    %c0_19 = arith.constant 0 : index
    %c0_20 = arith.constant 0 : index
    %33 = vector.load %arg8[%c0_19, %c0_20] : memref<256x16xf32, #tpu.memory_space<vmem>>, vector<256x16xf32>
    tpu.vector_store %arg8[%c0_19, %c0_20], %32 {strides = array<i32>} : memref<256x16xf32, #tpu.memory_space<vmem>>, vector<256x16xf32>,
    return
  }
  func.func @transform_0(%arg0: i32) -> (i32, i32) {
    %c0_i32 = arith.constant 0 : i32
    %c0_i32_0 = arith.constant 0 : i32
    return %arg0, %c0_i32 : i32, i32
  }
  func.func @transform_1(%arg0: i32) -> (i32, i32) {
    %c0_i32 = arith.constant 0 : i32
    %c0_i32_0 = arith.constant 0 : i32
    %c0_i32_1 = arith.constant 0 : i32
    return %c0_i32, %c0_i32_0 : i32, i32
  }
  func.func @transform_2(%arg0: i32) -> (i32, i32) {
    %c0_i32 = arith.constant 0 : i32
    %c0_i32_0 = arith.constant 0 : i32
    %c0_i32_1 = arith.constant 0 : i32
    return %c0_i32, %c0_i32_0 : i32, i32
  }
  func.func @transform_3(%arg0: i32) -> (i32, i32) {
    %c0_i32 = arith.constant 0 : i32
    %c0_i32_0 = arith.constant 0 : i32
    %c0_i32_1 = arith.constant 0 : i32
    return %c0_i32, %c0_i32_0 : i32, i32
  }
  func.func @transform_4(%arg0: i32) -> (i32, i32) {
    %c0_i32 = arith.constant 0 : i32
    %c0_i32_0 = arith.constant 0 : i32
    %c0_i32_1 = arith.constant 0 : i32
    return %c0_i32, %c0_i32_0 : i32, i32
  }
  func.func @transform_5(%arg0: i32) -> (i32, i32) {
    %c0_i32 = arith.constant 0 : i32
    %c0_i32_0 = arith.constant 0 : i32
    %c0_i32_1 = arith.constant 0 : i32
    return %c0_i32, %c0_i32_0 : i32, i32
  }
  func.func @transform_6(%arg0: i32) -> (i32, i32) {
    %c0_i32 = arith.constant 0 : i32
    %c0_i32_0 = arith.constant 0 : i32
    %c0_i32_1 = arith.constant 0 : i32
    return %c0_i32, %c0_i32_0 : i32, i32
  }
  func.func @transform_7(%arg0: i32) -> (i32, i32) {
    %c0_i32 = arith.constant 0 : i32
    %c0_i32_0 = arith.constant 0 : i32
    return %arg0, %c0_i32 : i32, i32
  }
}

</mosaic_0001>

<bundles_post_ra>
// kernel: tpu_custom_call.1
= control target key start
LH: loop header
LB: loop body
LE: loop exit
PB: predicated region body
PF: predicated region fallthrough
CT: control target
= control target key end

     0   :  { %s2046_s24 = smov 0   ;;  %s2595_s0 = inlined_call_operand.vmem [shape: bf16[512,16], index: 0, kind: input, shape index: {}]   ;;  %s2596_s1 = inlined_call_operand.vmem [shape: bf16[16,128], index: 1, kind: input, shape index: {}]   ;;  %s2597_s2 = inlined_call_operand.vmem [shape: f32[1,128], index: 2, kind: input, shape index: {}]   ;;  %s2598_s3 = inlined_call_operand.vmem [shape: bf16[128,64], index: 3, kind: input, shape index: {}]   ;;  %s2599_s4 = inlined_call_operand.vmem [shape: f32[1,64], index: 4, kind: input, shape index: {}]   ;;  %s2600_s5 = inlined_call_operand.vmem [shape: bf16[64,128], index: 5, kind: input, shape index: {}]   ;;  %s2601_s6 = inlined_call_operand.vmem [shape: f32[1,128], index: 6, kind: input, shape index: {}]   ;;  %s2602_s7 = inlined_call_operand.vmem [shape: f32[512,16], index: 7, kind: output, shape index: {}]  }
   0x1 LB: > { %s1573_s25 = sadd.s32 4294967295, %s2004_s24   ;;  %p1577_p0 = scmp.ge.s32.totalorder %s2004_s24, 1  ;;  %s2004_s24 = sphi %s2046_s24, %s17_s24  }
   0x2   : > { %p238_p1 = scmp.lt.s32.totalorder %s2004_s24, 3 }
   0x4   : > { %p239_p2 = pnand %p1577_p0, %p238_p1 }
   0x5   : > { %v1841_v0 = vld [vmem:[%s2596_s1] sm:$0xff] (!%p239_p2)   ;;  %s1578_s28 = sshll.u32 (!%p239_p2), %s1573_s25, 5  ;;  %vm410_vm0 = vcmask (!%p239_p2), 130048   ;;  %v1859_v8 = vld [vmem:[%s2598_s3 + $0x8] sm:$0xff] (!%p239_p2)   ;;  %v1860_v11 = vld [vmem:[%s2598_s3 + $0x10] sm:$0xff] (!%p239_p2)   ;;  %vm987_vm1 = vcmask (!%p239_p2), 523264  }
   0x6   : > { %242 = sbr.rel (%p239_p2) target bundleno = 1053 (0x41d), region = 48  ;;  %p271_p3 = scmp.lt.s32.totalorder (!%p239_p2), %s1578_s28, 63  ;;  %1709 = vmatprep.subr.bf16.mxu0 (!%p239_p2), %v1841_v0  ;;  %1831 = vmatprep.subr.bf16.mxu1 (!%p239_p2), %v1841_v0  ;;  %v1858_v1 = vld [vmem:[%s2598_s3] sm:$0xff] (!%p239_p2)   ;;  %v1861_v16 = vld [vmem:[%s2598_s3 + $0x18] sm:$0xff] (!%p239_p2)   ;;  %v1863_v21 = vld [vmem:[%s2598_s3 + $0x28] sm:$0xff] (!%p239_p2)  }
   0x7   : > { %1710 = vmatpush3.bf16.msra.mxu0 (!%p239_p2), %v1841_v0  ;;  %1832 = vmatpush3.bf16.msra.mxu1 (!%p239_p2), %v1841_v0  ;;  %v1862_v17 = vld [vmem:[%s2598_s3 + $0x20] sm:$0xff] (!%p239_p2)   ;;  %v1864_v23 = vld [vmem:[%s2598_s3 + $0x30] sm:$0xff] (!%p239_p2)   ;;  %v1865_v24 = vld [vmem:[%s2598_s3 + $0x38] sm:$0xff] (!%p239_p2)  }
   0x8   : > { %1743 = vmatprep.subr.bf16.mxu1 (!%p239_p2), %v1858_v1  ;;  %v1866_v25 = vld [vmem:[%s2600_s5] sm:$0xff] (!%p239_p2)   ;;  %v1867_v26 = vld [vmem:[%s2600_s5 + $0x8] sm:$0xff] (!%p239_p2)   ;;  %v1868_v27 = vld [vmem:[%s2600_s5 + $0x10] sm:$0xff] (!%p239_p2)  }
   0x9   : > { %1791 = vmatprep.subr.bf16.mxu0 (!%p239_p2), %v1866_v25  ;;  %v2133_v28 = vld [vmem:[%s2597_s2] ss:$0 sm:$0xff] (!%p239_p2) }
   0xd   : > { %s2604_s28 = smov (!%p271_p3, %s1578_s28), 63 }
   0xe   : > { %s1579_s8 = sshll.u32 %s2604_s28, 2  ;;  %s1581_s19 = sshll.u32 %s2604_s28, 3 }
   0xf   : > { %s2066_s11 = scalar_lea.vmem %s2595_s0, %s1579_s8  ;;  %s2494_s22 = scalar_lea.vmem %s2602_s7, %s1581_s19 }
  0x10   : > { %v1842_v2 = vld [vmem:[%s2066_s11] sm:$0xff]   ;;  %v1843_v3 = vld [vmem:[%s2066_s11 + $0x8] sm:$0xff]   ;;  %v1844_v4 = vld [vmem:[%s2066_s11 + $0x10] sm:$0xff]  }
  0x11   : > { %1711 = vmatprep.mubr.msk.bf16.mxu0 %vm410_vm0, %v1842_v2  ;;  %v1845_v5 = vld [vmem:[%s2066_s11 + $0x18] sm:$0xff]   ;;  %v1846_v6 = vld [vmem:[%s2066_s11 + $0x20] sm:$0xff]   ;;  %v1851_v9 = vld [vmem:[%s2066_s11 + $0x48] sm:$0xff]  }
  0x12   : > { %1712 = vmatmul.mubr.msk.bf16.vlgmr.msra.gmra.mrb[0].mxu0 %vm410_vm0, %v1843_v3  ;;  %v1850_v7 = vld [vmem:[%s2066_s11 + $0x40] sm:$0xff]   ;;  %v1852_v10 = vld [vmem:[%s2066_s11 + $0x50] sm:$0xff]   ;;  %v1847_v12 = vld [vmem:[%s2066_s11 + $0x28] sm:$0xff]  }
  0x13   : > { %1715 = vmatprep.mubr.msk.bf16.mxu0 %vm410_vm0, %v1844_v4  ;;  %1727 = vmatprep.mubr.msk.bf16.mxu1 %vm410_vm0, %v1850_v7  ;;  %v1848_v13 = vld [vmem:[%s2066_s11 + $0x30] sm:$0xff]   ;;  %v1853_v14 = vld [vmem:[%s2066_s11 + $0x58] sm:$0xff]   ;;  %v1854_v15 = vld [vmem:[%s2066_s11 + $0x60] sm:$0xff]  }
  0x14   : > { %1728 = vmatmul.mubr.msk.bf16.vlgmr.msra.gmra.mrb[0].mxu1 %vm410_vm0, %v1851_v9  ;;  %v1849_v18 = vld [vmem:[%s2066_s11 + $0x38] sm:$0xff]   ;;  %v1855_v19 = vld [vmem:[%s2066_s11 + $0x68] sm:$0xff]   ;;  %v1856_v20 = vld [vmem:[%s2066_s11 + $0x70] sm:$0xff]   ;;  %1792 = vmatpush3.bf16.msra.mxu0 %v1866_v25 }
  0x15   : > { %1731 = vmatprep.mubr.msk.bf16.mxu1 %vm410_vm0, %v1852_v10  ;;  %1744 = vmatpush3.bf16.msra.mxu1 %v1858_v1  ;;  %v1857_v22 = vld [vmem:[%s2066_s11 + $0x78] sm:$0xff]  }
  0x16   : > { %1745 = vmatprep.subr.bf16.mxu1 %v1859_v8  ;;  %1793 = vmatprep.subr.bf16.mxu0 %v1867_v26 }
  0x18   : > { %1794 = vmatpush3.bf16.msra.mxu0 %v1867_v26 }
  0x19   : > { %1746 = vmatpush3.bf16.msra.mxu1 %v1859_v8  ;;  %1795 = vmatprep.subr.bf16.mxu0 %v1868_v27 }
  0x1a   : > { %1716 = vmatmul.mubr.msk.bf16.gmra.mrb[4].mxu0 %vm410_vm0, %v1845_v5  ;;  %1747 = vmatprep.subr.bf16.mxu1 %v1860_v11 }
  0x1b   : > { %1719 = vmatprep.mubr.msk.bf16.mxu0 %vm410_vm0, %v1846_v6 }
  0x1c   : > { %1732 = vmatmul.mubr.msk.bf16.gmra.mrb[4].mxu1 %vm410_vm0, %v1853_v14  ;;  %1796 = vmatpush3.bf16.msra.mxu0 %v1868_v27 }
  0x1d   : > { %1735 = vmatprep.mubr.msk.bf16.mxu1 %vm410_vm0, %v1854_v15  ;;  %1748 = vmatpush3.bf16.msra.mxu1 %v1860_v11 }
  0x1e   : > { %1749 = vmatprep.subr.bf16.mxu1 %v1861_v16 }
  0x21   : > { %1750 = vmatpush3.bf16.msra.mxu1 %v1861_v16 }
  0x22   : > { %1720 = vmatmul.mubr.msk.bf16.gmra.mrb[8].mxu0 %vm410_vm0, %v1847_v12  ;;  %1751 = vmatprep.subr.bf16.mxu1 %v1862_v17 }
  0x23   : > { %1723 = vmatprep.mubr.msk.bf16.mxu0 %vm410_vm0, %v1848_v13 }
  0x24   : > { %1736 = vmatmul.mubr.msk.bf16.gmra.mrb[8].mxu1 %vm410_vm0, %v1855_v19 }
  0x25   : > { %1739 = vmatprep.mubr.msk.bf16.mxu1 %vm410_vm0, %v1856_v20  ;;  %1752 = vmatpush3.bf16.msra.mxu1 %v1862_v17 }
  0x26   : > { %1753 = vmatprep.subr.bf16.mxu1 %v1863_v21 }
  0x29   : > { %1754 = vmatpush3.bf16.msra.mxu1 %v1863_v21 }
  0x2a   : > { %1724 = vmatmul.mubr.msk.bf16.gmra.mrb[12].mxu0 %vm410_vm0, %v1849_v18  ;;  %1755 = vmatprep.subr.bf16.mxu1 %v1864_v23 }
  0x2c   : > { %1740 = vmatmul.mubr.msk.bf16.gmra.mrb[12].mxu1 %vm410_vm0, %v1857_v22 }
  0x2d   : > { %1756 = vmatpush3.bf16.msra.mxu1 %v1864_v23 }
  0x2e   : > { %1757 = vmatprep.subr.bf16.mxu1 %v1865_v24 }
  0x31   : > { %1758 = vmatpush3.bf16.msra.mxu1 %v1865_v24 }
  0xe5   : > { %v1713_v29 = vpop.f32.mrb[0].mxu0 }
  0xe6   : > { %v502_v30 = vadd.f32 %v1713_v29, %v2133_v28  ;;  %v493_v31 = vpop.f32.mrb[1].mxu0 }
  0xe7   : > { %v494_v32 = vadd.f32 %v2133_v28, %v493_v31  ;;  %v1714_v33 = vpop.f32.mrb[2].mxu0  ;;  %v1729_v44 = vpop.f32.mrb[0].mxu1 }
  0xe8   : > { %v505_v34 = vadd.f32 %v1714_v33, %v2133_v28  ;;  %v496_v35 = vpop.f32.mrb[3].mxu0  ;;  %v622_v37 = vmax.f32 %v502_v30, 0.0  ;;  %v566_v47 = vadd.f32 %v1729_v44, %v2133_v28  ;;  %v557_v48 = vpop.f32.mrb[1].mxu1 }
  0xe9   : > { %v497_v36 = vadd.f32 %v2133_v28, %v496_v35  ;;  %v620_v39 = vmax.f32 %v494_v32, 0.0  ;;  %v558_v51 = vadd.f32 %v2133_v28, %v557_v48  ;;  %v1730_v52 = vpop.f32.mrb[2].mxu1 }
  0xea   : > { %v623_v38 = vmax.f32 %v505_v34, 0.0  ;;  %v638_v56 = vmax.f32 %v566_v47, 0.0  ;;  %v569_v57 = vadd.f32 %v1730_v52, %v2133_v28  ;;  %v560_v58 = vpop.f32.mrb[3].mxu1 }
  0xeb   : > { %v621_v40 = vmax.f32 %v497_v36, 0.0  ;;  %v636_v60 = vmax.f32 %v558_v51, 0.0  ;;  %v561_v61 = vadd.f32 %v2133_v28, %v560_v58 }
  0xec   : > { %v653_v41 = vpack.c.bf16 %v623_v38, %v622_v37  ;;  %v639_v63 = vmax.f32 %v569_v57, 0.0 }
  0xed   : > { %v652_v42 = vpack.c.bf16 %v621_v40, %v620_v39  ;;  %v1717_v43 = vpop.f32.mrb[4].mxu0  ;;  %v637_v2 = vmax.f32 %v561_v61, 0.0 }
  0xee   : > { %v518_v45 = vadd.f32 %v1717_v43, %v2133_v28  ;;  %v509_v46 = vpop.f32.mrb[5].mxu0  ;;  %v2147_v4 = vpack.c.bf16 %v639_v63, %v638_v56 }
  0xef   : > { %v510_v49 = vadd.f32 %v2133_v28, %v509_v46  ;;  %v1718_v50 = vpop.f32.mrb[6].mxu0  ;;  %1759 = vmatprep.mubr.bf16.mxu1 %v652_v42  ;;  %v2149_v7 = vpack.c.bf16 %v637_v2, %v636_v60  ;;  %v1733_v8 = vpop.f32.mrb[4].mxu1 }
  0xf0   : > { %v626_v53 = vmax.f32 %v518_v45, 0.0  ;;  %v521_v54 = vadd.f32 %v1718_v50, %v2133_v28  ;;  %v512_v55 = vpop.f32.mrb[7].mxu0  ;;  %1760 = vmatmul.mubr.bf16.vlgmr.msra.gmra.mrb[16].mxu1 %v653_v41  ;;  %v582_v11 = vadd.f32 %v1733_v8, %v2133_v28  ;;  %v573_v12 = vpop.f32.mrb[5].mxu1 }
  0xf1   : > { %v513_v59 = vadd.f32 %v2133_v28, %v512_v55  ;;  %v624_v0 = vmax.f32 %v510_v49, 0.0  ;;  %v574_v15 = vadd.f32 %v2133_v28, %v573_v12  ;;  %v1734_v16 = vpop.f32.mrb[6].mxu1 }
  0xf2   : > { %v627_v62 = vmax.f32 %v521_v54, 0.0  ;;  %v642_v20 = vmax.f32 %v582_v11, 0.0  ;;  %v585_v21 = vadd.f32 %v1734_v16, %v2133_v28  ;;  %v576_v22 = vpop.f32.mrb[7].mxu1  ;;  %v1869_v16 = vld [vmem:[%s2600_s5 + $0x18] sm:$0xff]  }
  0xf3   : > { %v625_v1 = vmax.f32 %v513_v59, 0.0  ;;  %v640_v24 = vmax.f32 %v574_v15, 0.0  ;;  %v577_v25 = vadd.f32 %v2133_v28, %v576_v22  ;;  %1797 = vmatprep.subr.bf16.mxu0 %v1869_v16 }
  0xf4   : > { %v655_v3 = vpack.c.bf16 %v627_v62, %v626_v53  ;;  %v643_v27 = vmax.f32 %v585_v21, 0.0  ;;  %1798 = vmatpush3.bf16.msra.mxu0 %v1869_v16 }
  0xf5   : > { %v654_v5 = vpack.c.bf16 %v625_v1, %v624_v0  ;;  %v1721_v6 = vpop.f32.mrb[8].mxu0  ;;  %v641_v31 = vmax.f32 %v577_v25, 0.0 }
  0xf6   : > { %v534_v9 = vadd.f32 %v1721_v6, %v2133_v28  ;;  %v525_v10 = vpop.f32.mrb[9].mxu0  ;;  %v663_v33 = vpack.c.bf16 %v643_v27, %v642_v20 }
  0xf7   : > { %v526_v13 = vadd.f32 %v2133_v28, %v525_v10  ;;  %v1722_v14 = vpop.f32.mrb[10].mxu0  ;;  %1763 = vmatprep.mubr.bf16.mxu1 %v654_v5  ;;  %v662_v36 = vpack.c.bf16 %v641_v31, %v640_v24  ;;  %v1737_v37 = vpop.f32.mrb[8].mxu1 }
  0xf8   : > { %v630_v17 = vmax.f32 %v534_v9, 0.0  ;;  %v537_v18 = vadd.f32 %v1722_v14, %v2133_v28  ;;  %v528_v19 = vpop.f32.mrb[11].mxu0  ;;  %1764 = vmatmul.mubr.bf16.gmra.mrb[20].mxu1 %v655_v3  ;;  %v598_v40 = vadd.f32 %v1737_v37, %v2133_v28  ;;  %v589_v41 = vpop.f32.mrb[9].mxu1 }
  0xf9   : > { %v529_v23 = vadd.f32 %v2133_v28, %v528_v19  ;;  %v628_v29 = vmax.f32 %v526_v13, 0.0  ;;  %v590_v44 = vadd.f32 %v2133_v28, %v589_v41  ;;  %v1738_v45 = vpop.f32.mrb[10].mxu1 }
  0xfa   : > { %v631_v26 = vmax.f32 %v537_v18, 0.0  ;;  %v646_v49 = vmax.f32 %v598_v40, 0.0  ;;  %v601_v50 = vadd.f32 %v1738_v45, %v2133_v28  ;;  %v592_v51 = vpop.f32.mrb[11].mxu1 }
  0xfb   : > { %v629_v30 = vmax.f32 %v529_v23, 0.0  ;;  %v644_v53 = vmax.f32 %v590_v44, 0.0  ;;  %v593_v54 = vadd.f32 %v2133_v28, %v592_v51 }
  0xfc   : > { %v657_v32 = vpack.c.bf16 %v631_v26, %v630_v17  ;;  %v647_v56 = vmax.f32 %v601_v50, 0.0 }
  0xfd   : > { %v656_v34 = vpack.c.bf16 %v629_v30, %v628_v29  ;;  %v1725_v35 = vpop.f32.mrb[12].mxu0  ;;  %v645_v59 = vmax.f32 %v593_v54, 0.0 }
  0xfe   : > { %v550_v38 = vadd.f32 %v1725_v35, %v2133_v28  ;;  %v541_v39 = vpop.f32.mrb[13].mxu0  ;;  %v665_v61 = vpack.c.bf16 %v647_v56, %v646_v49 }
  0xff   : > { %v542_v42 = vadd.f32 %v2133_v28, %v541_v39  ;;  %v1726_v43 = vpop.f32.mrb[14].mxu0  ;;  %1767 = vmatprep.mubr.bf16.mxu1 %v656_v34  ;;  %v664_v63 = vpack.c.bf16 %v645_v59, %v644_v53  ;;  %v1741_v0 = vpop.f32.mrb[12].mxu1 }
 0x100   : > { %v634_v46 = vmax.f32 %v550_v38, 0.0  ;;  %v553_v47 = vadd.f32 %v1726_v43, %v2133_v28  ;;  %v544_v48 = vpop.f32.mrb[15].mxu0  ;;  %1768 = vmatmul.mubr.bf16.gmra.mrb[24].mxu1 %v657_v32  ;;  %v614_v1 = vadd.f32 %v1741_v0, %v2133_v28  ;;  %v605_v2 = vpop.f32.mrb[13].mxu1 }
 0x101   : > { %v545_v52 = vadd.f32 %v2133_v28, %v544_v48  ;;  %v632_v57 = vmax.f32 %v542_v42, 0.0  ;;  %v606_v3 = vadd.f32 %v2133_v28, %v605_v2  ;;  %v1742_v5 = vpop.f32.mrb[14].mxu1 }
 0x102   : > { %v635_v55 = vmax.f32 %v553_v47, 0.0  ;;  %v650_v6 = vmax.f32 %v614_v1, 0.0  ;;  %v617_v8 = vadd.f32 %v1742_v5, %v2133_v28  ;;  %v608_v9 = vpop.f32.mrb[15].mxu1 }
 0x103   : > { %v633_v58 = vmax.f32 %v545_v52, 0.0  ;;  %v648_v10 = vmax.f32 %v606_v3, 0.0  ;;  %v609_v11 = vadd.f32 %v2133_v28, %v608_v9  ;;  %v2179_v28 = vld [vmem:[%s2599_s4] ss:$0 sm:$0xff] }
 0x104   : > { %v659_v60 = vpack.c.bf16 %v635_v55, %v634_v46  ;;  %v651_v12 = vmax.f32 %v617_v8, 0.0 }
 0x105   : > { %v658_v62 = vpack.c.bf16 %v633_v58, %v632_v57  ;;  %v649_v13 = vmax.f32 %v609_v11, 0.0 }
 0x106   : > { %v667_v14 = vpack.c.bf16 %v651_v12, %v650_v6 }
 0x107   : > { %1771 = vmatprep.mubr.bf16.mxu1 %v658_v62  ;;  %v666_v15 = vpack.c.bf16 %v649_v13, %v648_v10 }
 0x108   : > { %1772 = vmatmul.mubr.bf16.gmra.mrb[28].mxu1 %v659_v60 }
 0x109   : > { %1775 = vmatprep.mubr.bf16.mxu1 %v2149_v7 }
 0x110   : > { %1776 = vmatmul.mubr.bf16.gmra.mrb[32].mxu1 %v2147_v4 }
 0x111   : > { %1779 = vmatprep.mubr.bf16.mxu1 %v662_v36 }
 0x118   : > { %1780 = vmatmul.mubr.bf16.gmra.mrb[36].mxu1 %v663_v33 }
 0x119   : > { %1783 = vmatprep.mubr.bf16.mxu1 %v664_v63 }
 0x120   : > { %1784 = vmatmul.mubr.bf16.gmra.mrb[40].mxu1 %v665_v61 }
 0x121   : > { %1787 = vmatprep.mubr.bf16.mxu1 %v666_v15 }
 0x128   : > { %1788 = vmatmul.mubr.bf16.gmra.mrb[44].mxu1 %v667_v14 }
 0x1c3   : > { %v1761_v7 = vpop.f32.mrb[16].mxu1 }
 0x1c4   : > { %v782_v4 = vadd.f32 %v1761_v7, %v2179_v28  ;;  %v773_v17 = vpop.f32.mrb[17].mxu1 }
 0x1c5   : > { %v774_v18 = vadd.f32 %v2179_v28, %v773_v17  ;;  %v1762_v19 = vpop.f32.mrb[18].mxu1 }
 0x1c6   : > { %v785_v20 = vadd.f32 %v1762_v19, %v2179_v28  ;;  %v776_v21 = vpop.f32.mrb[19].mxu1  ;;  %v902_v23 = vmax.f32 %v782_v4, 0.0 }
 0x1c7   : > { %v777_v22 = vadd.f32 %v2179_v28, %v776_v21  ;;  %v900_v25 = vmax.f32 %v774_v18, 0.0 }
 0x1c8   : > { %v903_v24 = vmax.f32 %v785_v20, 0.0 }
 0x1c9   : > { %v901_v26 = vmax.f32 %v777_v22, 0.0 }
 0x1ca   : > { %v933_v27 = vpack.c.bf16 %v903_v24, %v902_v23 }
 0x1cb   : > { %v932_v29 = vpack.c.bf16 %v901_v26, %v900_v25  ;;  %v1765_v30 = vpop.f32.mrb[20].mxu1 }
 0x1cc   : > { %v798_v31 = vadd.f32 %v1765_v30, %v2179_v28  ;;  %v789_v32 = vpop.f32.mrb[21].mxu1 }
 0x1cd   : > { %v790_v33 = vadd.f32 %v2179_v28, %v789_v32  ;;  %v1766_v34 = vpop.f32.mrb[22].mxu1  ;;  %1799 = vmatprep.mubr.msk.bf16.mxu0 %vm987_vm1, %v932_v29 }
 0x1ce   : > { %v801_v35 = vadd.f32 %v1766_v34, %v2179_v28  ;;  %v792_v36 = vpop.f32.mrb[23].mxu1  ;;  %1800 = vmatmul.mubr.msk.bf16.vlgmr.msra.gmra.mrb[16].mxu0 %vm987_vm1, %v933_v27  ;;  %v906_v38 = vmax.f32 %v798_v31, 0.0 }
 0x1cf   : > { %v793_v37 = vadd.f32 %v2179_v28, %v792_v36  ;;  %v904_v40 = vmax.f32 %v790_v33, 0.0 }
 0x1d0   : > { %v907_v39 = vmax.f32 %v801_v35, 0.0 }
 0x1d1   : > { %v905_v41 = vmax.f32 %v793_v37, 0.0 }
 0x1d2   : > { %v935_v42 = vpack.c.bf16 %v907_v39, %v906_v38 }
 0x1d3   : > { %v934_v43 = vpack.c.bf16 %v905_v41, %v904_v40  ;;  %v1769_v44 = vpop.f32.mrb[24].mxu1 }
 0x1d4   : > { %v814_v45 = vadd.f32 %v1769_v44, %v2179_v28  ;;  %v805_v46 = vpop.f32.mrb[25].mxu1 }
 0x1d5   : > { %v806_v47 = vadd.f32 %v2179_v28, %v805_v46  ;;  %v1770_v48 = vpop.f32.mrb[26].mxu1  ;;  %1803 = vmatprep.mubr.msk.bf16.mxu0 %vm987_vm1, %v934_v43 }
 0x1d6   : > { %v817_v49 = vadd.f32 %v1770_v48, %v2179_v28  ;;  %v808_v50 = vpop.f32.mrb[27].mxu1  ;;  %1804 = vmatmul.mubr.msk.bf16.gmra.mrb[20].mxu0 %vm987_vm1, %v935_v42  ;;  %v910_v52 = vmax.f32 %v814_v45, 0.0 }
 0x1d7   : > { %v809_v51 = vadd.f32 %v2179_v28, %v808_v50  ;;  %v908_v54 = vmax.f32 %v806_v47, 0.0 }
 0x1d8   : > { %v911_v53 = vmax.f32 %v817_v49, 0.0 }
 0x1d9   : > { %v909_v55 = vmax.f32 %v809_v51, 0.0 }
 0x1da   : > { %v937_v56 = vpack.c.bf16 %v911_v53, %v910_v52 }
 0x1db   : > { %v936_v57 = vpack.c.bf16 %v909_v55, %v908_v54  ;;  %v1773_v58 = vpop.f32.mrb[28].mxu1 }
 0x1dc   : > { %v830_v59 = vadd.f32 %v1773_v58, %v2179_v28  ;;  %v821_v60 = vpop.f32.mrb[29].mxu1 }
 0x1dd   : > { %v822_v61 = vadd.f32 %v2179_v28, %v821_v60  ;;  %v1774_v62 = vpop.f32.mrb[30].mxu1  ;;  %1807 = vmatprep.mubr.msk.bf16.mxu0 %vm987_vm1, %v936_v57 }
 0x1de   : > { %v833_v63 = vadd.f32 %v1774_v62, %v2179_v28  ;;  %v824_v0 = vpop.f32.mrb[31].mxu1  ;;  %1808 = vmatmul.mubr.msk.bf16.gmra.mrb[24].mxu0 %vm987_vm1, %v937_v56  ;;  %v914_v2 = vmax.f32 %v830_v59, 0.0 }
 0x1df   : > { %v825_v1 = vadd.f32 %v2179_v28, %v824_v0  ;;  %v912_v5 = vmax.f32 %v822_v61, 0.0 }
 0x1e0   : > { %v915_v3 = vmax.f32 %v833_v63, 0.0 }
 0x1e1   : > { %v913_v6 = vmax.f32 %v825_v1, 0.0  ;;  %v2232_v1 = vld [vmem:[%s2601_s6] ss:$0 sm:$0xff] }
 0x1e2   : > { %v939_v8 = vpack.c.bf16 %v915_v3, %v914_v2 }
 0x1e3   : > { %v938_v9 = vpack.c.bf16 %v913_v6, %v912_v5  ;;  %v1777_v10 = vpop.f32.mrb[32].mxu1 }
 0x1e4   : > { %v846_v11 = vadd.f32 %v1777_v10, %v2179_v28  ;;  %v837_v12 = vpop.f32.mrb[33].mxu1 }
 0x1e5   : > { %v838_v13 = vadd.f32 %v2179_v28, %v837_v12  ;;  %v1778_v14 = vpop.f32.mrb[34].mxu1  ;;  %1811 = vmatprep.mubr.msk.bf16.mxu0 %vm987_vm1, %v938_v9 }
 0x1e6   : > { %v849_v15 = vadd.f32 %v1778_v14, %v2179_v28  ;;  %v840_v16 = vpop.f32.mrb[35].mxu1  ;;  %1812 = vmatmul.mubr.msk.bf16.gmra.mrb[28].mxu0 %vm987_vm1, %v939_v8  ;;  %v918_v4 = vmax.f32 %v846_v11, 0.0 }
 0x1e7   : > { %v841_v7 = vadd.f32 %v2179_v28, %v840_v16  ;;  %v916_v18 = vmax.f32 %v838_v13, 0.0 }
 0x1e8   : > { %v919_v17 = vmax.f32 %v849_v15, 0.0 }
 0x1e9   : > { %v917_v19 = vmax.f32 %v841_v7, 0.0 }
 0x1ea   : > { %v941_v20 = vpack.c.bf16 %v919_v17, %v918_v4 }
 0x1eb   : > { %v940_v21 = vpack.c.bf16 %v917_v19, %v916_v18  ;;  %v1781_v22 = vpop.f32.mrb[36].mxu1 }
 0x1ec   : > { %v862_v23 = vadd.f32 %v1781_v22, %v2179_v28  ;;  %v853_v24 = vpop.f32.mrb[37].mxu1 }
 0x1ed   : > { %v854_v25 = vadd.f32 %v2179_v28, %v853_v24  ;;  %v1782_v26 = vpop.f32.mrb[38].mxu1  ;;  %1815 = vmatprep.mubr.msk.bf16.mxu0 %vm987_vm1, %v940_v21 }
 0x1ee   : > { %v865_v27 = vadd.f32 %v1782_v26, %v2179_v28  ;;  %v856_v29 = vpop.f32.mrb[39].mxu1  ;;  %1816 = vmatmul.mubr.msk.bf16.gmra.mrb[32].mxu0 %vm987_vm1, %v941_v20  ;;  %v922_v31 = vmax.f32 %v862_v23, 0.0 }
 0x1ef   : > { %v857_v30 = vadd.f32 %v2179_v28, %v856_v29  ;;  %v920_v33 = vmax.f32 %v854_v25, 0.0 }
 0x1f0   : > { %v923_v32 = vmax.f32 %v865_v27, 0.0 }
 0x1f1   : > { %v921_v34 = vmax.f32 %v857_v30, 0.0 }
 0x1f2   : > { %v943_v35 = vpack.c.bf16 %v923_v32, %v922_v31 }
 0x1f3   : > { %v942_v36 = vpack.c.bf16 %v921_v34, %v920_v33  ;;  %v1785_v37 = vpop.f32.mrb[40].mxu1 }
 0x1f4   : > { %v878_v38 = vadd.f32 %v1785_v37, %v2179_v28  ;;  %v869_v39 = vpop.f32.mrb[41].mxu1 }
 0x1f5   : > { %v870_v40 = vadd.f32 %v2179_v28, %v869_v39  ;;  %v1786_v41 = vpop.f32.mrb[42].mxu1  ;;  %1819 = vmatprep.mubr.msk.bf16.mxu0 %vm987_vm1, %v942_v36 }
 0x1f6   : > { %v881_v42 = vadd.f32 %v1786_v41, %v2179_v28  ;;  %v872_v43 = vpop.f32.mrb[43].mxu1  ;;  %1820 = vmatmul.mubr.msk.bf16.gmra.mrb[36].mxu0 %vm987_vm1, %v943_v35  ;;  %v926_v45 = vmax.f32 %v878_v38, 0.0 }
 0x1f7   : > { %v873_v44 = vadd.f32 %v2179_v28, %v872_v43  ;;  %v924_v47 = vmax.f32 %v870_v40, 0.0 }
 0x1f8   : > { %v927_v46 = vmax.f32 %v881_v42, 0.0 }
 0x1f9   : > { %v925_v48 = vmax.f32 %v873_v44, 0.0 }
 0x1fa   : > { %v945_v49 = vpack.c.bf16 %v927_v46, %v926_v45 }
 0x1fb   : > { %v944_v50 = vpack.c.bf16 %v925_v48, %v924_v47  ;;  %v1789_v51 = vpop.f32.mrb[44].mxu1 }
 0x1fc   : > { %v894_v52 = vadd.f32 %v1789_v51, %v2179_v28  ;;  %v885_v53 = vpop.f32.mrb[45].mxu1 }
 0x1fd   : > { %v886_v54 = vadd.f32 %v2179_v28, %v885_v53  ;;  %v1790_v55 = vpop.f32.mrb[46].mxu1  ;;  %1823 = vmatprep.mubr.msk.bf16.mxu0 %vm987_vm1, %v944_v50 }
 0x1fe   : > { %v897_v56 = vadd.f32 %v1790_v55, %v2179_v28  ;;  %v888_v57 = vpop.f32.mrb[47].mxu1  ;;  %1824 = vmatmul.mubr.msk.bf16.gmra.mrb[40].mxu0 %vm987_vm1, %v945_v49  ;;  %v930_v59 = vmax.f32 %v894_v52, 0.0 }
 0x1ff   : > { %v889_v58 = vadd.f32 %v2179_v28, %v888_v57  ;;  %v928_v61 = vmax.f32 %v886_v54, 0.0 }
 0x200   : > { %v931_v60 = vmax.f32 %v897_v56, 0.0 }
 0x201   : > { %v929_v62 = vmax.f32 %v889_v58, 0.0 }
 0x202   : > { %v947_v63 = vpack.c.bf16 %v931_v60, %v930_v59 }
 0x203   : > { %v946_v0 = vpack.c.bf16 %v929_v62, %v928_v61 }
 0x205   : > { %1827 = vmatprep.mubr.msk.bf16.mxu0 %vm987_vm1, %v946_v0 }
 0x206   : > { %1828 = vmatmul.mubr.msk.bf16.gmra.mrb[44].mxu0 %vm987_vm1, %v947_v63 }
 0x2a1   : > { %v1801_v2 = vpop.f32.mrb[16].mxu0 }
 0x2a2   : > { %v2235_v3 = vadd.f32 %v1801_v2, %v2232_v1  ;;  %v1070_v28 = vpop.f32.mrb[17].mxu0 }
 0x2a3   : > { %v2238_v5 = vadd.f32 %v2232_v1, %v1070_v28  ;;  %v1802_v6 = vpop.f32.mrb[18].mxu0 }
 0x2a4   : > { %1201 = vmax.xlane.f32.xlu1 %v2235_v3  ;;  %v1073_v8 = vpop.f32.mrb[19].mxu0  ;;  %v2243_v9 = vadd.f32 %v1802_v6, %v2232_v1 }
 0x2a5   : > { %1197 = vmax.xlane.f32.xlu0 %v2238_v5  ;;  %v2246_v10 = vadd.f32 %v2232_v1, %v1073_v8 }
 0x2a8   : > { %1203 = vmax.xlane.f32.xlu1 %v2243_v9 }
 0x2a9   : > { %v1805_v11 = vpop.f32.mrb[20].mxu0  ;;  %1199 = vmax.xlane.f32.xlu0 %v2246_v10 }
 0x2aa   : > { %v2251_v12 = vadd.f32 %v1805_v11, %v2232_v1  ;;  %v1086_v13 = vpop.f32.mrb[21].mxu0 }
 0x2ab   : > { %v1806_v14 = vpop.f32.mrb[22].mxu0  ;;  %v2259_v7 = vadd.f32 %v2232_v1, %v1086_v13 }
 0x2ac   : > { %v2254_v15 = vadd.f32 %v1806_v14, %v2232_v1  ;;  %v1089_v16 = vpop.f32.mrb[23].mxu0 }
 0x2ad   : > { %1209 = vmax.xlane.f32.xlu0 %v2251_v12  ;;  %v2262_v4 = vadd.f32 %v2232_v1, %v1089_v16 }
 0x2ae   : > { %1211 = vmax.xlane.f32.xlu1 %v2254_v15 }
 0x2b1   : > { %v1809_v17 = vpop.f32.mrb[24].mxu0  ;;  %1205 = vmax.xlane.f32.xlu0 %v2259_v7 }
 0x2b2   : > { %v2266_v18 = vadd.f32 %v1809_v17, %v2232_v1  ;;  %v1102_v19 = vpop.f32.mrb[25].mxu0  ;;  %1207 = vmax.xlane.f32.xlu1 %v2262_v4 }
 0x2b3   : > { %v1810_v20 = vpop.f32.mrb[26].mxu0  ;;  %v2275_v23 = vadd.f32 %v2232_v1, %v1102_v19 }
 0x2b4   : > { %v2270_v21 = vadd.f32 %v1810_v20, %v2232_v1  ;;  %v1105_v22 = vpop.f32.mrb[27].mxu0 }
 0x2b5   : > { %1217 = vmax.xlane.f32.xlu0 %v2266_v18  ;;  %v2278_v24 = vadd.f32 %v2232_v1, %v1105_v22 }
 0x2b6   : > { %1219 = vmax.xlane.f32.xlu1 %v2270_v21 }
 0x2b9   : > { %v1813_v25 = vpop.f32.mrb[28].mxu0  ;;  %1213 = vmax.xlane.f32.xlu0 %v2275_v23 }
 0x2ba   : > { %v2282_v26 = vadd.f32 %v1813_v25, %v2232_v1  ;;  %v1118_v27 = vpop.f32.mrb[29].mxu0  ;;  %1215 = vmax.xlane.f32.xlu1 %v2278_v24 }
 0x2bb   : > { %v1814_v29 = vpop.f32.mrb[30].mxu0  ;;  %v2291_v32 = vadd.f32 %v2232_v1, %v1118_v27 }
 0x2bc   : > { %v2286_v30 = vadd.f32 %v1814_v29, %v2232_v1  ;;  %v1121_v31 = vpop.f32.mrb[31].mxu0 }
 0x2bd   : > { %1225 = vmax.xlane.f32.xlu0 %v2282_v26  ;;  %v2294_v33 = vadd.f32 %v2232_v1, %v1121_v31 }
 0x2be   : > { %1227 = vmax.xlane.f32.xlu1 %v2286_v30 }
 0x2c1   : > { %v1817_v34 = vpop.f32.mrb[32].mxu0  ;;  %1221 = vmax.xlane.f32.xlu0 %v2291_v32 }
 0x2c2   : > { %v2298_v35 = vadd.f32 %v1817_v34, %v2232_v1  ;;  %v1134_v36 = vpop.f32.mrb[33].mxu0  ;;  %1223 = vmax.xlane.f32.xlu1 %v2294_v33 }
 0x2c3   : > { %v1818_v37 = vpop.f32.mrb[34].mxu0  ;;  %v2307_v40 = vadd.f32 %v2232_v1, %v1134_v36 }
 0x2c4   : > { %v2302_v38 = vadd.f32 %v1818_v37, %v2232_v1  ;;  %v1137_v39 = vpop.f32.mrb[35].mxu0 }
 0x2c5   : > { %1233 = vmax.xlane.f32.xlu0 %v2298_v35  ;;  %v2310_v41 = vadd.f32 %v2232_v1, %v1137_v39 }
 0x2c6   : > { %1235 = vmax.xlane.f32.xlu1 %v2302_v38 }
 0x2c9   : > { %v1821_v42 = vpop.f32.mrb[36].mxu0  ;;  %1229 = vmax.xlane.f32.xlu0 %v2307_v40 }
 0x2ca   : > { %v2314_v43 = vadd.f32 %v1821_v42, %v2232_v1  ;;  %v1150_v44 = vpop.f32.mrb[37].mxu0  ;;  %1231 = vmax.xlane.f32.xlu1 %v2310_v41 }
 0x2cb   : > { %v1822_v45 = vpop.f32.mrb[38].mxu0  ;;  %v2323_v48 = vadd.f32 %v2232_v1, %v1150_v44 }
 0x2cc   : > { %v2318_v46 = vadd.f32 %v1822_v45, %v2232_v1  ;;  %v1153_v47 = vpop.f32.mrb[39].mxu0 }
 0x2cd   : > { %1241 = vmax.xlane.f32.xlu0 %v2314_v43  ;;  %v2326_v49 = vadd.f32 %v2232_v1, %v1153_v47 }
 0x2ce   : > { %1243 = vmax.xlane.f32.xlu1 %v2318_v46 }
 0x2d1   : > { %v1825_v50 = vpop.f32.mrb[40].mxu0  ;;  %1237 = vmax.xlane.f32.xlu0 %v2323_v48 }
 0x2d2   : > { %v2330_v51 = vadd.f32 %v1825_v50, %v2232_v1  ;;  %v1166_v52 = vpop.f32.mrb[41].mxu0  ;;  %1239 = vmax.xlane.f32.xlu1 %v2326_v49 }
 0x2d3   : > { %v1826_v53 = vpop.f32.mrb[42].mxu0  ;;  %v2339_v56 = vadd.f32 %v2232_v1, %v1166_v52 }
 0x2d4   : > { %v2334_v54 = vadd.f32 %v1826_v53, %v2232_v1  ;;  %v1169_v55 = vpop.f32.mrb[43].mxu0 }
 0x2d5   : > { %1249 = vmax.xlane.f32.xlu0 %v2330_v51  ;;  %v2342_v57 = vadd.f32 %v2232_v1, %v1169_v55 }
 0x2d6   : > { %1251 = vmax.xlane.f32.xlu1 %v2334_v54 }
 0x2d9   : > { %v1829_v58 = vpop.f32.mrb[44].mxu0  ;;  %1245 = vmax.xlane.f32.xlu0 %v2339_v56 }
 0x2da   : > { %v1182_v59 = vpop.f32.mrb[45].mxu0  ;;  %1247 = vmax.xlane.f32.xlu1 %v2342_v57  ;;  %v2354_v0 = vadd.f32 %v1829_v58, %v2232_v1 }
 0x2db   : > { %v2347_v60 = vadd.f32 %v2232_v1, %v1182_v59  ;;  %v1830_v61 = vpop.f32.mrb[46].mxu0 }
 0x2dc   : > { %v1185_v62 = vpop.f32.mrb[47].mxu0  ;;  %v2358_v2 = vadd.f32 %v1830_v61, %v2232_v1 }
 0x2dd   : > { %v2350_v63 = vadd.f32 %v2232_v1, %v1185_v62  ;;  %1253 = vmax.xlane.f32.xlu0 %v2347_v60 }
 0x2df   : > { %1255 = vmax.xlane.f32.xlu1 %v2350_v63 }
 0x2e1   : > { %1257 = vmax.xlane.f32.xlu0 %v2354_v0 }
 0x2e3   : > { %1259 = vmax.xlane.f32.xlu1 %v2358_v2 }
 0x331   : > { %v1202_v28 = vpop.xlane.xlu1 %1201 }
 0x332   : > { %v1263_v6 = vsub.f32 %v2235_v3, %v1202_v28  ;;  %v1198_v8 = vpop.xlane.xlu0 %1197 }
 0x333   : > { %v1261_v11 = vsub.f32 %v2238_v5, %v1198_v8 }
 0x334   : > { %v1297_v13 = vmul.f32 1.442695, %v1263_v6 }
 0x335   : > { %v1293_v14 = vmul.f32 1.442695, %v1261_v11  ;;  %v1204_v16 = vpop.xlane.xlu1 %1203 }
 0x336   : > { %1870 = vpow2.f32 %v1297_v13  ;;  %v1264_v17 = vsub.f32 %v2243_v9, %v1204_v16  ;;  %v1200_v19 = vpop.xlane.xlu0 %1199 }
 0x337   : > { %v1262_v1 = vsub.f32 %v2246_v10, %v1200_v19  ;;  %1872 = vpow2.f32 %v1293_v14 }
 0x338   : > { %v1299_v20 = vmul.f32 1.442695, %v1264_v17 }
 0x339   : > { %v1295_v22 = vmul.f32 1.442695, %v1262_v1 }
 0x33a   : > { %1874 = vpow2.f32 %v1299_v20  ;;  %v1210_v25 = vpop.xlane.xlu0 %1209 }
 0x33b   : > { %v1267_v27 = vsub.f32 %v2251_v12, %v1210_v25  ;;  %v1212_v3 = vpop.xlane.xlu1 %1211  ;;  %1876 = vpow2.f32 %v1295_v22 }
 0x33c   : > { %v1268_v29 = vsub.f32 %v2254_v15, %v1212_v3 }
 0x33d   : > { %v1305_v5 = vmul.f32 1.442695, %v1267_v27 }
 0x33e   : > { %v1307_v31 = vmul.f32 1.442695, %v1268_v29  ;;  %v1206_v34 = vpop.xlane.xlu0 %1205 }
 0x33f   : > { %1878 = vpow2.f32 %v1305_v5  ;;  %v1265_v9 = vsub.f32 %v2259_v7, %v1206_v34  ;;  %v1208_v36 = vpop.xlane.xlu1 %1207 }
 0x340   : > { %v2369_v37 = vpop.eup %1870  ;;  %v1266_v10 = vsub.f32 %v2262_v4, %v1208_v36  ;;  %1880 = vpow2.f32 %v1307_v31 }
 0x341   : > { %v1301_v39 = vmul.f32 1.442695, %v1265_v9  ;;  %1361 = vadd.xlane.f32.xlu0 %v2369_v37  ;;  %v2373_v44 = vpop.eup %1872 }
 0x342   : > { %v1303_v12 = vmul.f32 1.442695, %v1266_v10  ;;  %v1218_v42 = vpop.xlane.xlu0 %1217 }
 0x343   : > { %1882 = vpow2.f32 %v1301_v39  ;;  %v1271_v15 = vsub.f32 %v2266_v18, %v1218_v42  ;;  %v1220_v45 = vpop.xlane.xlu1 %1219 }
 0x344   : > { %v2376_v47 = vpop.eup %1874  ;;  %v1272_v7 = vsub.f32 %v2270_v21, %v1220_v45  ;;  %1884 = vpow2.f32 %v1303_v12 }
 0x345   : > { %v1313_v50 = vmul.f32 1.442695, %v1271_v15  ;;  %1363 = vadd.xlane.f32.xlu1 %v2376_v47  ;;  %1357 = vadd.xlane.f32.xlu0 %v2373_v44  ;;  %v2382_v58 = vpop.eup %1876 }
 0x346   : > { %v1315_v4 = vmul.f32 1.442695, %v1272_v7  ;;  %v1214_v52 = vpop.xlane.xlu0 %1213 }
 0x347   : > { %1886 = vpow2.f32 %v1313_v50  ;;  %v1269_v53 = vsub.f32 %v2275_v23, %v1214_v52  ;;  %v1216_v55 = vpop.xlane.xlu1 %1215 }
 0x348   : > { %v1270_v18 = vsub.f32 %v2278_v24, %v1216_v55  ;;  %1888 = vpow2.f32 %v1315_v4 }
 0x349   : > { %v2385_v59 = vpop.eup %1878  ;;  %v1309_v61 = vmul.f32 1.442695, %v1269_v53  ;;  %1359 = vadd.xlane.f32.xlu1 %v2382_v58 }
 0x34a   : > { %v1311_v21 = vmul.f32 1.442695, %v1270_v18  ;;  %1369 = vadd.xlane.f32.xlu0 %v2385_v59  ;;  %v1226_v62 = vpop.xlane.xlu0 %1225  ;;  %v2390_v23 = vpop.eup %1880 }
 0x34b   : > { %1890 = vpow2.f32 %v1309_v61  ;;  %v1275_v28 = vsub.f32 %v2282_v26, %v1226_v62  ;;  %v1228_v6 = vpop.xlane.xlu1 %1227 }
 0x34c   : > { %v1276_v8 = vsub.f32 %v2286_v30, %v1228_v6  ;;  %1892 = vpow2.f32 %v1311_v21 }
 0x34d   : > { %v2393_v11 = vpop.eup %1882  ;;  %v1321_v24 = vmul.f32 1.442695, %v1275_v28  ;;  %1371 = vadd.xlane.f32.xlu1 %v2390_v23 }
 0x34e   : > { %v1323_v13 = vmul.f32 1.442695, %v1276_v8  ;;  %1365 = vadd.xlane.f32.xlu0 %v2393_v11  ;;  %v1222_v14 = vpop.xlane.xlu0 %1221  ;;  %v2398_v26 = vpop.eup %1884 }
 0x34f   : > { %1894 = vpow2.f32 %v1321_v24  ;;  %v1273_v16 = vsub.f32 %v2291_v32, %v1222_v14  ;;  %v1224_v17 = vpop.xlane.xlu1 %1223 }
 0x350   : > { %v1274_v19 = vsub.f32 %v2294_v33, %v1224_v17  ;;  %1896 = vpow2.f32 %v1323_v13 }
 0x351   : > { %v2401_v1 = vpop.eup %1886  ;;  %v1317_v30 = vmul.f32 1.442695, %v1273_v16  ;;  %1367 = vadd.xlane.f32.xlu1 %v2398_v26 }
 0x352   : > { %v1319_v20 = vmul.f32 1.442695, %v1274_v19  ;;  %1377 = vadd.xlane.f32.xlu0 %v2401_v1  ;;  %v1234_v22 = vpop.xlane.xlu0 %1233  ;;  %v2406_v32 = vpop.eup %1888 }
 0x353   : > { %1898 = vpow2.f32 %v1317_v30  ;;  %v1279_v25 = vsub.f32 %v2298_v35, %v1234_v22  ;;  %v1236_v27 = vpop.xlane.xlu1 %1235 }
 0x354   : > { %v1280_v3 = vsub.f32 %v2302_v38, %v1236_v27  ;;  %1900 = vpow2.f32 %v1319_v20 }
 0x355   : > { %v2409_v29 = vpop.eup %1890  ;;  %v1329_v33 = vmul.f32 1.442695, %v1279_v25  ;;  %1379 = vadd.xlane.f32.xlu1 %v2406_v32 }
 0x356   : > { %v1331_v5 = vmul.f32 1.442695, %v1280_v3  ;;  %1373 = vadd.xlane.f32.xlu0 %v2409_v29  ;;  %v1230_v31 = vpop.xlane.xlu0 %1229  ;;  %v2414_v35 = vpop.eup %1892 }
 0x357   : > { %1902 = vpow2.f32 %v1329_v33  ;;  %v1277_v34 = vsub.f32 %v2307_v40, %v1230_v31  ;;  %v1232_v9 = vpop.xlane.xlu1 %1231 }
 0x358   : > { %v1278_v36 = vsub.f32 %v2310_v41, %v1232_v9  ;;  %1904 = vpow2.f32 %v1331_v5 }
 0x359   : > { %v2417_v10 = vpop.eup %1894  ;;  %v1325_v38 = vmul.f32 1.442695, %v1277_v34  ;;  %1375 = vadd.xlane.f32.xlu1 %v2414_v35 }
 0x35a   : > { %v1327_v39 = vmul.f32 1.442695, %v1278_v36  ;;  %1385 = vadd.xlane.f32.xlu0 %v2417_v10  ;;  %v1242_v12 = vpop.xlane.xlu0 %1241  ;;  %v2422_v40 = vpop.eup %1896 }
 0x35b   : > { %1906 = vpow2.f32 %v1325_v38  ;;  %v1283_v42 = vsub.f32 %v2314_v43, %v1242_v12  ;;  %v1244_v15 = vpop.xlane.xlu1 %1243 }
 0x35c   : > { %v1284_v45 = vsub.f32 %v2318_v46, %v1244_v15  ;;  %1908 = vpow2.f32 %v1327_v39 }
 0x35d   : > { %v2425_v7 = vpop.eup %1898  ;;  %v1337_v41 = vmul.f32 1.442695, %v1283_v42  ;;  %1387 = vadd.xlane.f32.xlu1 %v2422_v40 }
 0x35e   : > { %v1339_v50 = vmul.f32 1.442695, %v1284_v45  ;;  %1381 = vadd.xlane.f32.xlu0 %v2425_v7  ;;  %v1238_v4 = vpop.xlane.xlu0 %1237  ;;  %v2430_v43 = vpop.eup %1900 }
 0x35f   : > { %1910 = vpow2.f32 %v1337_v41  ;;  %v1281_v52 = vsub.f32 %v2323_v48, %v1238_v4  ;;  %v1240_v53 = vpop.xlane.xlu1 %1239 }
 0x360   : > { %v1282_v55 = vsub.f32 %v2326_v49, %v1240_v53  ;;  %1912 = vpow2.f32 %v1339_v50 }
 0x361   : > { %v2433_v18 = vpop.eup %1902  ;;  %v1333_v46 = vmul.f32 1.442695, %v1281_v52  ;;  %1383 = vadd.xlane.f32.xlu1 %v2430_v43 }
 0x362   : > { %v1335_v61 = vmul.f32 1.442695, %v1282_v55  ;;  %1393 = vadd.xlane.f32.xlu0 %v2433_v18  ;;  %v1250_v21 = vpop.xlane.xlu0 %1249  ;;  %v2438_v48 = vpop.eup %1904 }
 0x363   : > { %1914 = vpow2.f32 %v1333_v46  ;;  %v1287_v62 = vsub.f32 %v2330_v51, %v1250_v21  ;;  %v1252_v28 = vpop.xlane.xlu1 %1251 }
 0x364   : > { %v1288_v6 = vsub.f32 %v2334_v54, %v1252_v28  ;;  %1916 = vpow2.f32 %v1335_v61 }
 0x365   : > { %v2441_v8 = vpop.eup %1906  ;;  %v1345_v49 = vmul.f32 1.442695, %v1287_v62  ;;  %1395 = vadd.xlane.f32.xlu1 %v2438_v48 }
 0x366   : > { %v1347_v24 = vmul.f32 1.442695, %v1288_v6  ;;  %1389 = vadd.xlane.f32.xlu0 %v2441_v8  ;;  %v1246_v13 = vpop.xlane.xlu0 %1245  ;;  %v2446_v51 = vpop.eup %1908 }
 0x367   : > { %1918 = vpow2.f32 %v1345_v49  ;;  %v1285_v14 = vsub.f32 %v2339_v56, %v1246_v13  ;;  %v1248_v16 = vpop.xlane.xlu1 %1247 }
 0x368   : > { %v1286_v17 = vsub.f32 %v2342_v57, %v1248_v16  ;;  %1920 = vpow2.f32 %v1347_v24 }
 0x369   : > { %v2449_v19 = vpop.eup %1910  ;;  %v1341_v54 = vmul.f32 1.442695, %v1285_v14  ;;  %1391 = vadd.xlane.f32.xlu1 %v2446_v51 }
 0x36a   : > { %v1343_v30 = vmul.f32 1.442695, %v1286_v17  ;;  %1401 = vadd.xlane.f32.xlu0 %v2449_v19  ;;  %v1254_v20 = vpop.xlane.xlu0 %1253  ;;  %v2454_v25 = vpop.eup %1912 }
 0x36b   : > { %1922 = vpow2.f32 %v1341_v54  ;;  %v1289_v22 = vsub.f32 %v2347_v60, %v1254_v20 }
 0x36c   : > { %v1256_v56 = vpop.xlane.xlu1 %1255  ;;  %1924 = vpow2.f32 %v1343_v30 }
 0x36d   : > { %v2456_v27 = vpop.eup %1914  ;;  %v1349_v3 = vmul.f32 1.442695, %v1289_v22  ;;  %v1290_v57 = vsub.f32 %v2350_v63, %v1256_v56  ;;  %1403 = vadd.xlane.f32.xlu1 %v2454_v25 }
 0x36e   : > { %1397 = vadd.xlane.f32.xlu0 %v2456_v27  ;;  %v1258_v33 = vpop.xlane.xlu0 %1257  ;;  %v2462_v34 = vpop.eup %1916 }
 0x36f   : > { %1926 = vpow2.f32 %v1349_v3  ;;  %v1351_v5 = vmul.f32 1.442695, %v1290_v57  ;;  %v1291_v31 = vsub.f32 %v2354_v0, %v1258_v33 }
 0x370   : > { %v1260_v60 = vpop.xlane.xlu1 %1259 }
 0x371   : > { %v2464_v9 = vpop.eup %1918  ;;  %1928 = vpow2.f32 %v1351_v5  ;;  %v1353_v36 = vmul.f32 1.442695, %v1291_v31  ;;  %v1292_v38 = vsub.f32 %v2358_v2, %v1260_v60  ;;  %1399 = vadd.xlane.f32.xlu1 %v2462_v34 }
 0x372   : > { %1409 = vadd.xlane.f32.xlu0 %v2464_v9  ;;  %v2469_v39 = vpop.eup %1920 }
 0x373   : > { %1930 = vpow2.f32 %v1353_v36  ;;  %v1355_v63 = vmul.f32 1.442695, %v1292_v38 }
 0x375   : > { %v2471_v12 = vpop.eup %1922  ;;  %1932 = vpow2.f32 %v1355_v63  ;;  %1411 = vadd.xlane.f32.xlu1 %v2469_v39 }
 0x376   : > { %1405 = vadd.xlane.f32.xlu0 %v2471_v12  ;;  %v2475_v0 = vpop.eup %1924 }
 0x379   : > { %v2477_v42 = vpop.eup %1926  ;;  %1407 = vadd.xlane.f32.xlu1 %v2475_v0 }
 0x37a   : > { %1413 = vadd.xlane.f32.xlu0 %v2477_v42 }
 0x37b   : > { %v2481_v2 = vpop.eup %1928 }
 0x37d   : > { %v2483_v15 = vpop.eup %1930  ;;  %1415 = vadd.xlane.f32.xlu1 %v2481_v2 }
 0x37e   : > { %1417 = vadd.xlane.f32.xlu0 %v2483_v15 }
 0x37f   : > { %v2487_v45 = vpop.eup %1932 }
 0x381   : > { %1419 = vadd.xlane.f32.xlu1 %v2487_v45 }
 0x3ce   : > { %v1362_v41 = vpop.xlane.xlu0 %1361 }
 0x3cf   : > { %1934 = vrcp.f32 %v1362_v41 }
 0x3d2   : > { %v1364_v50 = vpop.xlane.xlu1 %1363  ;;  %v1358_v4 = vpop.xlane.xlu0 %1357 }
 0x3d3   : > { %1936 = vrcp.f32 %v1364_v50 }
 0x3d4   : > { %1938 = vrcp.f32 %v1358_v4 }
 0x3d6   : > { %v1360_v52 = vpop.xlane.xlu1 %1359 }
 0x3d7   : > { %1940 = vrcp.f32 %v1360_v52  ;;  %v1370_v53 = vpop.xlane.xlu0 %1369 }
 0x3d8   : > { %1942 = vrcp.f32 %v1370_v53 }
 0x3d9   : > { %v1935_v55 = vpop.eup %1934 }
 0x3da   : > { %v1455_v46 = vmul.f32 %v1935_v55, %v2369_v37  ;;  %v1372_v61 = vpop.xlane.xlu1 %1371 }
 0x3db   : > { %1944 = vrcp.f32 %v1372_v61  ;;  %v1366_v21 = vpop.xlane.xlu0 %1365 }
 0x3dc   : > { %1487 = vst.msk [vmem:[%s2494_s22 + $0x10] sm:$0xff] %vm410_vm0, %v1455_v46  ;;  %1946 = vrcp.f32 %v1366_v21 }
 0x3dd   : > { %v1937_v62 = vpop.eup %1936 }
 0x3de   : > { %v1939_v28 = vpop.eup %1938  ;;  %v1456_v6 = vmul.f32 %v1937_v62, %v2376_v47  ;;  %v1368_v49 = vpop.xlane.xlu1 %1367 }
 0x3df   : > { %v1453_v24 = vmul.f32 %v1939_v28, %v2373_v44  ;;  %1948 = vrcp.f32 %v1368_v49  ;;  %v1378_v13 = vpop.xlane.xlu0 %1377 }
 0x3e0   : > { %1488 = vst.msk [vmem:[%s2494_s22 + $0x18] sm:$0xff] %vm410_vm0, %v1456_v6  ;;  %1950 = vrcp.f32 %v1378_v13 }
 0x3e1   : > { %v1941_v37 = vpop.eup %1940  ;;  %1485 = vst.msk [vmem:[%s2494_s22] sm:$0xff] %vm410_vm0, %v1453_v24 }
 0x3e2   : > { %v1943_v14 = vpop.eup %1942  ;;  %v1454_v16 = vmul.f32 %v1941_v37, %v2382_v58  ;;  %v1380_v17 = vpop.xlane.xlu1 %1379 }
 0x3e3   : > { %v1459_v54 = vmul.f32 %v1943_v14, %v2385_v59  ;;  %1952 = vrcp.f32 %v1380_v17  ;;  %v1374_v47 = vpop.xlane.xlu0 %1373 }
 0x3e4   : > { %1486 = vst.msk [vmem:[%s2494_s22 + $0x8] sm:$0xff] %vm410_vm0, %v1454_v16  ;;  %1954 = vrcp.f32 %v1374_v47 }
 0x3e5   : > { %v1945_v44 = vpop.eup %1944  ;;  %1491 = vst.msk [vmem:[%s2494_s22 + $0x30] sm:$0xff] %vm410_vm0, %v1459_v54 }
 0x3e6   : > { %v1947_v30 = vpop.eup %1946  ;;  %v1460_v20 = vmul.f32 %v1945_v44, %v2390_v23  ;;  %v1376_v22 = vpop.xlane.xlu1 %1375 }
 0x3e7   : > { %v1457_v56 = vmul.f32 %v1947_v30, %v2393_v11  ;;  %1956 = vrcp.f32 %v1376_v22  ;;  %v1386_v58 = vpop.xlane.xlu0 %1385 }
 0x3e8   : > { %1492 = vst.msk [vmem:[%s2494_s22 + $0x38] sm:$0xff] %vm410_vm0, %v1460_v20  ;;  %1958 = vrcp.f32 %v1386_v58 }
 0x3e9   : > { %v1949_v59 = vpop.eup %1948  ;;  %1489 = vst.msk [vmem:[%s2494_s22 + $0x20] sm:$0xff] %vm410_vm0, %v1457_v56 }
 0x3ea   : > { %v1951_v3 = vpop.eup %1950  ;;  %v1458_v57 = vmul.f32 %v1949_v59, %v2398_v26  ;;  %v1388_v33 = vpop.xlane.xlu1 %1387 }
 0x3eb   : > { %v1463_v5 = vmul.f32 %v1951_v3, %v2401_v1  ;;  %1960 = vrcp.f32 %v1388_v33  ;;  %v1382_v23 = vpop.xlane.xlu0 %1381 }
 0x3ec   : > { %1490 = vst.msk [vmem:[%s2494_s22 + $0x28] sm:$0xff] %vm410_vm0, %v1458_v57  ;;  %1962 = vrcp.f32 %v1382_v23 }
 0x3ed   : > { %v1953_v11 = vpop.eup %1952  ;;  %1495 = vst.msk [vmem:[%s2494_s22 + $0x50] sm:$0xff] %vm410_vm0, %v1463_v5 }
 0x3ee   : > { %v1955_v31 = vpop.eup %1954  ;;  %v1464_v60 = vmul.f32 %v1953_v11, %v2406_v32  ;;  %v1384_v36 = vpop.xlane.xlu1 %1383 }
 0x3ef   : > { %v1461_v38 = vmul.f32 %v1955_v31, %v2409_v29  ;;  %1964 = vrcp.f32 %v1384_v36  ;;  %v1394_v26 = vpop.xlane.xlu0 %1393 }
 0x3f0   : > { %1496 = vst.msk [vmem:[%s2494_s22 + $0x58] sm:$0xff] %vm410_vm0, %v1464_v60  ;;  %1966 = vrcp.f32 %v1394_v26 }
 0x3f1   : > { %v1957_v1 = vpop.eup %1956  ;;  %1493 = vst.msk [vmem:[%s2494_s22 + $0x40] sm:$0xff] %vm410_vm0, %v1461_v38 }
 0x3f2   : > { %v1959_v63 = vpop.eup %1958  ;;  %v1462_v41 = vmul.f32 %v1957_v1, %v2414_v35  ;;  %v1396_v50 = vpop.xlane.xlu1 %1395 }
 0x3f3   : > { %v1467_v4 = vmul.f32 %v1959_v63, %v2417_v10  ;;  %1968 = vrcp.f32 %v1396_v50  ;;  %v1390_v32 = vpop.xlane.xlu0 %1389 }
 0x3f4   : > { %1494 = vst.msk [vmem:[%s2494_s22 + $0x48] sm:$0xff] %vm410_vm0, %v1462_v41  ;;  %1970 = vrcp.f32 %v1390_v32 }
 0x3f5   : > { %v1961_v29 = vpop.eup %1960  ;;  %1499 = vst.msk [vmem:[%s2494_s22 + $0x70] sm:$0xff] %vm410_vm0, %v1467_v4 }
 0x3f6   : > { %v1963_v52 = vpop.eup %1962  ;;  %v1468_v53 = vmul.f32 %v1961_v29, %v2422_v40  ;;  %v1392_v55 = vpop.xlane.xlu1 %1391 }
 0x3f7   : > { %v1465_v46 = vmul.f32 %v1963_v52, %v2425_v7  ;;  %1972 = vrcp.f32 %v1392_v55  ;;  %v1402_v35 = vpop.xlane.xlu0 %1401 }
 0x3f8   : > { %1500 = vst.msk [vmem:[%s2494_s22 + $0x78] sm:$0xff] %vm410_vm0, %v1468_v53  ;;  %1974 = vrcp.f32 %v1402_v35 }
 0x3f9   : > { %v1965_v10 = vpop.eup %1964  ;;  %1497 = vst.msk [vmem:[%s2494_s22 + $0x60] sm:$0xff] %vm410_vm0, %v1465_v46 }
 0x3fa   : > { %v1967_v61 = vpop.eup %1966  ;;  %v1466_v21 = vmul.f32 %v1965_v10, %v2430_v43  ;;  %v1404_v62 = vpop.xlane.xlu1 %1403 }
 0x3fb   : > { %v1471_v28 = vmul.f32 %v1967_v61, %v2433_v18  ;;  %1976 = vrcp.f32 %v1404_v62  ;;  %v1398_v40 = vpop.xlane.xlu0 %1397 }
 0x3fc   : > { %1498 = vst.msk [vmem:[%s2494_s22 + $0x68] sm:$0xff] %vm410_vm0, %v1466_v21  ;;  %1978 = vrcp.f32 %v1398_v40 }
 0x3fd   : > { %v1969_v7 = vpop.eup %1968  ;;  %1503 = vst.msk [vmem:[%s2494_s22 + $0x90] sm:$0xff] %vm410_vm0, %v1471_v28 }
 0x3fe   : > { %v1971_v6 = vpop.eup %1970  ;;  %v1472_v49 = vmul.f32 %v1969_v7, %v2438_v48  ;;  %v1400_v24 = vpop.xlane.xlu1 %1399 }
 0x3ff   : > { %v1469_v13 = vmul.f32 %v1971_v6, %v2441_v8  ;;  %1980 = vrcp.f32 %v1400_v24  ;;  %v1410_v43 = vpop.xlane.xlu0 %1409 }
 0x400   : > { %1504 = vst.msk [vmem:[%s2494_s22 + $0x98] sm:$0xff] %vm410_vm0, %v1472_v49  ;;  %1982 = vrcp.f32 %v1410_v43 }
 0x401   : > { %v1973_v18 = vpop.eup %1972  ;;  %1501 = vst.msk [vmem:[%s2494_s22 + $0x80] sm:$0xff] %vm410_vm0, %v1469_v13 }
 0x402   : > { %v1975_v37 = vpop.eup %1974  ;;  %v1470_v14 = vmul.f32 %v1973_v18, %v2446_v51  ;;  %v1412_v16 = vpop.xlane.xlu1 %1411 }
 0x403   : > { %v1475_v17 = vmul.f32 %v1975_v37, %v2449_v19  ;;  %1984 = vrcp.f32 %v1412_v16  ;;  %v1406_v48 = vpop.xlane.xlu0 %1405 }
 0x404   : > { %1502 = vst.msk [vmem:[%s2494_s22 + $0x88] sm:$0xff] %vm410_vm0, %v1470_v14  ;;  %1986 = vrcp.f32 %v1406_v48 }
 0x405   : > { %v1977_v8 = vpop.eup %1976  ;;  %1507 = vst.msk [vmem:[%s2494_s22 + $0xb0] sm:$0xff] %vm410_vm0, %v1475_v17 }
 0x406   : > { %v1979_v54 = vpop.eup %1978  ;;  %v1476_v47 = vmul.f32 %v1977_v8, %v2454_v25  ;;  %v1408_v44 = vpop.xlane.xlu1 %1407 }
 0x407   : > { %v1473_v30 = vmul.f32 %v1979_v54, %v2456_v27  ;;  %1988 = vrcp.f32 %v1408_v44  ;;  %v1414_v51 = vpop.xlane.xlu0 %1413 }
 0x408   : > { %1508 = vst.msk [vmem:[%s2494_s22 + $0xb8] sm:$0xff] %vm410_vm0, %v1476_v47  ;;  %1990 = vrcp.f32 %v1414_v51 }
 0x409   : > { %v1981_v19 = vpop.eup %1980  ;;  %1505 = vst.msk [vmem:[%s2494_s22 + $0xa0] sm:$0xff] %vm410_vm0, %v1473_v30 }
 0x40a   : > { %v1983_v20 = vpop.eup %1982  ;;  %v1474_v22 = vmul.f32 %v1981_v19, %v2462_v34  ;;  %v1416_v56 = vpop.xlane.xlu1 %1415 }
 0x40b   : > { %v1479_v25 = vmul.f32 %v1983_v20, %v2464_v9  ;;  %1992 = vrcp.f32 %v1416_v56  ;;  %v1418_v58 = vpop.xlane.xlu0 %1417 }
 0x40c   : > { %1506 = vst.msk [vmem:[%s2494_s22 + $0xa8] sm:$0xff] %vm410_vm0, %v1474_v22  ;;  %1994 = vrcp.f32 %v1418_v58 }
 0x40d   : > { %v1985_v27 = vpop.eup %1984  ;;  %1511 = vst.msk [vmem:[%s2494_s22 + $0xd0] sm:$0xff] %vm410_vm0, %v1479_v25 }
 0x40e   : > { %v1987_v59 = vpop.eup %1986  ;;  %v1480_v3 = vmul.f32 %v1985_v27, %v2469_v39  ;;  %v1420_v57 = vpop.xlane.xlu1 %1419 }
 0x40f   : > { %v1477_v34 = vmul.f32 %v1987_v59, %v2471_v12  ;;  %1996 = vrcp.f32 %v1420_v57 }
 0x410   : > { %1512 = vst.msk [vmem:[%s2494_s22 + $0xd8] sm:$0xff] %vm410_vm0, %v1480_v3 }
 0x411   : > { %v1989_v9 = vpop.eup %1988  ;;  %1509 = vst.msk [vmem:[%s2494_s22 + $0xc0] sm:$0xff] %vm410_vm0, %v1477_v34 }
 0x412   : > { %v1991_v33 = vpop.eup %1990  ;;  %v1478_v5 = vmul.f32 %v1989_v9, %v2475_v0 }
 0x413   : > { %v1481_v23 = vmul.f32 %v1991_v33, %v2477_v42 }
 0x414   : > { %1510 = vst.msk [vmem:[%s2494_s22 + $0xc8] sm:$0xff] %vm410_vm0, %v1478_v5 }
 0x415   : > { %v1993_v39 = vpop.eup %1992  ;;  %1513 = vst.msk [vmem:[%s2494_s22 + $0xe0] sm:$0xff] %vm410_vm0, %v1481_v23 }
 0x416   : > { %v1995_v11 = vpop.eup %1994  ;;  %v1482_v12 = vmul.f32 %v1993_v39, %v2481_v2 }
 0x417   : > { %v1483_v31 = vmul.f32 %v1995_v11, %v2483_v15 }
 0x418   : > { %1514 = vst.msk [vmem:[%s2494_s22 + $0xe8] sm:$0xff] %vm410_vm0, %v1482_v12 }
 0x419   : > { %v1997_v60 = vpop.eup %1996  ;;  %1515 = vst.msk [vmem:[%s2494_s22 + $0xf0] sm:$0xff] %vm410_vm0, %v1483_v31 }
 0x41a   : > { %v1484_v36 = vmul.f32 %v1997_v60, %v2487_v45 }
 0x41c   : > { %1516 = vst.msk [vmem:[%s2494_s22 + $0xf8] sm:$0xff] %vm410_vm0, %v1484_v36 }
 0x41d PF: > { %s17_s24 = sadd.s32 1, %s2004_s24  }
 0x41e   : > { %p14_p4 = scmp.ge.s32.totalorder %s17_s24, 4  }
 0x420   :  { %16 = sbr.rel (!%p14_p4) target bundleno = 1 (0x1), region = 78 }

</bundles_post_ra>
